<compile_context>
chip_gen: v7x
topology: tpu7x:2x2x1
jax: 0.10.0
libtpu: 0.0.40
codegen_flags: <defaults>
</compile_context>

<pallas_src>
import functools

import jax
import jax.numpy as jnp
from jax.experimental import pallas as pl
from jax.experimental.pallas import tpu as pltpu

OUT_PAD = 128  # lane-dense padded width of the final projection (one vreg lane width)


def _round_up(a: int, b: int) -> int:
    return (a + b - 1) // b * b


def _head_kernel(x_ref, w1_ref, b1_ref, w2_ref, b2_ref, o_ref):
    # x_ref:  (TILE_N, 2*D)  f32 (cast to compute dtype in-kernel)
    # w1_ref: (2*D, D)       compute dtype (bf16 or f32)
    # b1_ref: (1, D)         f32
    # w2_ref: (D, OUT_PAD)   compute dtype (zero-padded beyond the 2 classes)
    # b2_ref: (1, OUT_PAD)   f32 (zero-padded)
    # o_ref:  (TILE_N, OUT_PAD)
    x = x_ref[...].astype(w1_ref.dtype)          # in-kernel cast (free under MXU)
    h = jnp.dot(x, w1_ref[...], preferred_element_type=jnp.float32)
    h = jnp.tanh(h + b1_ref[...])                # bias add + tanh in f32
    # TODO(synk): training-mode (stochastic) dropout not implemented; identity
    # here matches the PyTorch module in eval mode.
    h = h.astype(w2_ref.dtype)
    out = jnp.dot(h, w2_ref[...], preferred_element_type=jnp.float32) + b2_ref[...]
    o_ref[...] = out.astype(o_ref.dtype)


def prepare_head_params(w_dense, b_dense, w_out, b_out,
                        compute_dtype=jnp.bfloat16):
    """One-time weight prep (hoist out of any hot loop): transposes, the
    compute-dtype cast, and the 128-lane pad of the output projection."""
    d_model = w_dense.shape[0]
    n_cls = int(w_out.shape[0])  # == 2

    w1 = jnp.asarray(w_dense, jnp.float32).T.astype(compute_dtype)       # (2D, D)
    b1 = jnp.asarray(b_dense, jnp.float32).reshape(1, d_model)           # (1, D)

    # Zero-pad the tiny (D, 2) projection to (D, 128) for lane-dense stores.
    w2 = jnp.zeros((d_model, OUT_PAD), dtype=compute_dtype)
    w2 = w2.at[:, :n_cls].set(jnp.asarray(w_out, jnp.float32).T.astype(compute_dtype))
    b2 = jnp.zeros((1, OUT_PAD), dtype=jnp.float32)
    b2 = b2.at[:, :n_cls].set(jnp.asarray(b_out, jnp.float32))
    return (w1, b1, w2, b2), n_cls


def _pick_tile(n: int, tile_n: int) -> int:
    # ~>=4 grid steps for large N (keeps both v7x TCs busy), floor 256 for MXU
    # M-fill, multiple of 16 (bf16 sublane packing), never larger than
    # round_up(n, 16).
    target = max(256, _round_up(pl.cdiv(n, 4), 256))
    tile = min(tile_n, target, _round_up(n, 16))
    return max(16, _round_up(tile, 16))


@functools.partial(jax.jit, static_argnames=("n_cls", "tile_n", "out_dtype"))
def apply_head(features, w1, b1, w2, b2, *, n_cls, tile_n=1024,
               out_dtype=jnp.float32):
    """features: (..., d_model). Returns (N, n_cls), N = numel / (2*d_model).

    tile_n=1024 + 48 MiB VMEM limit is safe on v7x (64 MiB VMEM); on v5e/v6e
    (128 MiB VMEM) tile_n up to 2048 with vmem_limit_bytes ~96 MiB amortizes
    per-grid-step overhead further.
    """
    d_model = features.shape[-1]

    x = features.reshape(-1, 2 * d_model)        # glue reshape, stays f32
    n = x.shape[0]

    tile = _pick_tile(n, tile_n)
    grid = (pl.cdiv(n, tile),)                   # ragged last block: masked stores

    out_padded = pl.pallas_call(
        _head_kernel,
        out_shape=jax.ShapeDtypeStruct((n, OUT_PAD), out_dtype),
        grid=grid,
        in_specs=[
            pl.BlockSpec((tile, 2 * d_model), lambda i: (i, 0)),      # x: streamed
            pl.BlockSpec((2 * d_model, d_model), lambda i: (0, 0)),   # W1: resident
            pl.BlockSpec((1, d_model), lambda i: (0, 0)),             # b1: resident
            pl.BlockSpec((d_model, OUT_PAD), lambda i: (0, 0)),       # W2: resident
            pl.BlockSpec((1, OUT_PAD), lambda i: (0, 0)),             # b2: resident
        ],
        out_specs=pl.BlockSpec((tile, OUT_PAD), lambda i: (i, 0)),
        compiler_params=pltpu.CompilerParams(
            dimension_semantics=("parallel",),   # v7x: shard row tiles on 2 TCs
            vmem_limit_bytes=48 * 1024 * 1024,   # headroom under v7x's 64 MiB
        ),
    )(x, w1, b1, w2, b2)

    # Only the first n_cls lanes are real (n_cls is static here).
    return out_padded[:, :n_cls]


def roberta_classification_head(features, w_dense, b_dense, w_out, b_out, *,
                                compute_dtype=jnp.bfloat16, tile_n=1024,
                                out_dtype=jnp.float32):
    """Convenience wrapper; in a real loop call prepare_head_params once."""
    (w1, b1, w2, b2), n_cls = prepare_head_params(
        w_dense, b_dense, w_out, b_out, compute_dtype)
    return apply_head(features, w1, b1, w2, b2,
                      n_cls=n_cls, tile_n=tile_n, out_dtype=out_dtype)


def _reference(features, w_dense, b_dense, w_out, b_out):
    d_model = features.shape[-1]
    x = features.reshape(-1, 2 * d_model)
    h = jnp.tanh(x @ w_dense.T + b_dense)
    return h @ w_out.T + b_out


if __name__ == "__main__":
    key = jax.random.PRNGKey(0)
    d_model = 32
    batch, seq = 2, 8                            # features (2, 8, 32) -> x (8, 64)

    k1, k2, k3, k4, k5 = jax.random.split(key, 5)
    features = jax.random.normal(k1, (batch, seq, d_model), dtype=jnp.float32)
    # nn.Linear(d_model*2, d_model): weight (d_model, 2*d_model), bias (d_model,)
    w_dense = jax.random.normal(k2, (d_model, 2 * d_model), dtype=jnp.float32) * 0.05
    b_dense = jax.random.normal(k3, (d_model,), dtype=jnp.float32) * 0.05
    # nn.Linear(d_model, 2): weight (2, d_model), bias (2,)
    w_out = jax.random.normal(k4, (2, d_model), dtype=jnp.float32) * 0.05
    b_out = jax.random.normal(k5, (2,), dtype=jnp.float32) * 0.05

    ref = _reference(features, w_dense, b_dense, w_out, b_out)
    n_rows = batch * seq * d_model // (2 * d_model)

    # --- f32 compute path (tolerance accounts for TPU default f32 matmul
    #     precision, which may use bf16 passes on the MXU) ---
    out_f32 = roberta_classification_head(
        features, w_dense, b_dense, w_out, b_out,
        compute_dtype=jnp.float32, out_dtype=jnp.float32)
    out_f32 = jax.block_until_ready(out_f32)
    assert out_f32.shape == (n_rows, 2)
    assert jnp.allclose(out_f32, ref, atol=5e-3, rtol=5e-3), "f32 mismatch vs reference"

    # --- bf16 path (production config): looser tolerance due to bf16 operands ---
    out_bf16 = roberta_classification_head(
        features, w_dense, b_dense, w_out, b_out,
        compute_dtype=jnp.bfloat16, out_dtype=jnp.float32)
    out_bf16 = jax.block_until_ready(out_bf16)
    assert out_bf16.shape == (n_rows, 2)
    assert jnp.allclose(out_bf16, ref, atol=3e-2, rtol=3e-2), "bf16 mismatch vs reference"

    print("KERNEL_OK")
</pallas_src>

<mosaic_0001>
module attributes {stable_mosaic.version = 11 : i64} {
  func.func @_head_kernel(%arg0: i32, %arg1: memref<16x64xf32, #tpu.memory_space<vmem>>, %arg2: memref<64x32xf32, #tpu.memory_space<vmem>>, %arg3: memref<1x32xf32, #tpu.memory_space<vmem>>, %arg4: memref<32x128xf32, #tpu.memory_space<vmem>>, %arg5: memref<1x128xf32, #tpu.memory_space<vmem>>, %arg6: memref<16x128xf32, #tpu.memory_space<vmem>>) attributes {dimension_semantics = [#tpu.dimension_semantics<parallel>], iteration_bounds = array<i64: 1>, scalar_prefetch = 0 : i64, scratch_operands = 0 : i64, tpu.core_type = #tpu.core_type<tc>, window_params = [{transform_indices = @transform_0, window_bounds = array<i64: 16, 64>}, {pipeline_mode = #tpu.pipeline_mode<synchronous>, transform_indices = @transform_1, window_bounds = array<i64: 64, 32>}, {pipeline_mode = #tpu.pipeline_mode<synchronous>, transform_indices = @transform_2, window_bounds = array<i64: 1, 32>}, {pipeline_mode = #tpu.pipeline_mode<synchronous>, transform_indices = @transform_3, window_bounds = array<i64: 32, 128>}, {pipeline_mode = #tpu.pipeline_mode<synchronous>, transform_indices = @transform_4, window_bounds = array<i64: 1, 128>}, {transform_indices = @transform_5, window_bounds = array<i64: 16, 128>}]} {
    %c0 = arith.constant 0 : index
    %c0_0 = arith.constant 0 : index
    %0 = vector.load %arg1[%c0, %c0_0] : memref<16x64xf32, #tpu.memory_space<vmem>>, vector<16x64xf32>
    %c0_1 = arith.constant 0 : index
    %c0_2 = arith.constant 0 : index
    %1 = vector.load %arg2[%c0_1, %c0_2] : memref<64x32xf32, #tpu.memory_space<vmem>>, vector<64x32xf32>
    %cst = arith.constant dense<0.000000e+00> : vector<16x32xf32>
    %2 = tpu.matmul %0, %1, %cst {dimension_numbers = #tpu.dot_dimension_numbers<[1], [0], [0], [1], [0, 0, 1, 1], [], []>} : vector<16x64xf32>, vector<64x32xf32>, vector<16x32xf32> -> vector<16x32xf32>
    %c0_3 = arith.constant 0 : index
    %c0_4 = arith.constant 0 : index
    %3 = vector.load %arg3[%c0_3, %c0_4] : memref<1x32xf32, #tpu.memory_space<vmem>>, vector<1x32xf32>
    %4 = vector.broadcast %3 : vector<1x32xf32> to vector<16x32xf32>
    %5 = arith.addf %2, %4 : vector<16x32xf32>
    %6 = math.tanh %5 : vector<16x32xf32>
    %c0_5 = arith.constant 0 : index
    %c0_6 = arith.constant 0 : index
    %7 = vector.load %arg4[%c0_5, %c0_6] : memref<32x128xf32, #tpu.memory_space<vmem>>, vector<32x128xf32>
    %cst_7 = arith.constant dense<0.000000e+00> : vector<16x128xf32>
    %8 = tpu.matmul %6, %7, %cst_7 {dimension_numbers = #tpu.dot_dimension_numbers<[1], [0], [0], [1], [0, 0, 1, 1], [], []>} : vector<16x32xf32>, vector<32x128xf32>, vector<16x128xf32> -> vector<16x128xf32>
    %c0_8 = arith.constant 0 : index
    %c0_9 = arith.constant 0 : index
    %9 = vector.load %arg5[%c0_8, %c0_9] : memref<1x128xf32, #tpu.memory_space<vmem>>, vector<1x128xf32>
    %10 = vector.broadcast %9 : vector<1x128xf32> to vector<16x128xf32>
    %11 = arith.addf %8, %10 : vector<16x128xf32>
    %c0_10 = arith.constant 0 : index
    %c0_11 = arith.constant 0 : index
    %12 = vector.load %arg6[%c0_10, %c0_11] : memref<16x128xf32, #tpu.memory_space<vmem>>, vector<16x128xf32>
    tpu.vector_store %arg6[%c0_10, %c0_11], %11 {strides = array<i32>} : memref<16x128xf32, #tpu.memory_space<vmem>>, vector<16x128xf32>,
    return
  }
  func.func @transform_0(%arg0: i32) -> (i32, i32) {
    %c0_i32 = arith.constant 0 : i32
    %c0_i32_0 = arith.constant 0 : i32
    return %arg0, %c0_i32 : i32, i32
  }
  func.func @transform_1(%arg0: i32) -> (i32, i32) {
    %c0_i32 = arith.constant 0 : i32
    %c0_i32_0 = arith.constant 0 : i32
    %c0_i32_1 = arith.constant 0 : i32
    return %c0_i32, %c0_i32_0 : i32, i32
  }
  func.func @transform_2(%arg0: i32) -> (i32, i32) {
    %c0_i32 = arith.constant 0 : i32
    %c0_i32_0 = arith.constant 0 : i32
    %c0_i32_1 = arith.constant 0 : i32
    return %c0_i32, %c0_i32_0 : i32, i32
  }
  func.func @transform_3(%arg0: i32) -> (i32, i32) {
    %c0_i32 = arith.constant 0 : i32
    %c0_i32_0 = arith.constant 0 : i32
    %c0_i32_1 = arith.constant 0 : i32
    return %c0_i32, %c0_i32_0 : i32, i32
  }
  func.func @transform_4(%arg0: i32) -> (i32, i32) {
    %c0_i32 = arith.constant 0 : i32
    %c0_i32_0 = arith.constant 0 : i32
    %c0_i32_1 = arith.constant 0 : i32
    return %c0_i32, %c0_i32_0 : i32, i32
  }
  func.func @transform_5(%arg0: i32) -> (i32, i32) {
    %c0_i32 = arith.constant 0 : i32
    %c0_i32_0 = arith.constant 0 : i32
    return %arg0, %c0_i32 : i32, i32
  }
}

</mosaic_0001>

<bundles_post_ra>
// kernel: apply_head.1
= control target key start
LH: loop header
LB: loop body
LE: loop exit
PB: predicated region body
PF: predicated region fallthrough
CT: control target
= control target key end

     0   :  { %vm37_vm0 = vcmask 523264   ;;  %vm132_vm1 = vcmask 261120   ;;  %s419_s0 = inlined_call_operand.vmem [shape: f32[8,64], index: 0, kind: input, shape index: {}]   ;;  %s420_s1 = inlined_call_operand.vmem [shape: f32[64,32], index: 1, kind: input, shape index: {}]   ;;  %s421_s2 = inlined_call_operand.vmem [shape: f32[1,32], index: 2, kind: input, shape index: {}]   ;;  %s422_s3 = inlined_call_operand.vmem [shape: f32[32,128], index: 3, kind: input, shape index: {}]   ;;  %s423_s4 = inlined_call_operand.vmem [shape: f32[1,128], index: 4, kind: input, shape index: {}]   ;;  %s424_s5 = inlined_call_operand.vmem [shape: f32[8,128], index: 5, kind: output, shape index: {}]  }
   0x1   :  { %v22_v0 = vld [vmem:[%s420_s1] sm:$0xff]  ;;  %v23_v1 = vld [vmem:[%s420_s1 + $0x8] sm:$0xff]  ;;  %v24_v2 = vld [vmem:[%s420_s1 + $0x10] sm:$0xff] }
   0x2   :  { %v308_v3 = vpack.c.bf16 %v23_v1, %v22_v0  ;;  %v25_v4 = vld [vmem:[%s420_s1 + $0x18] sm:$0xff]  ;;  %v26_v6 = vld [vmem:[%s420_s1 + $0x20] sm:$0xff]  ;;  %v27_v7 = vld [vmem:[%s420_s1 + $0x28] sm:$0xff] }
   0x3   :  { %v312_v5 = vpack.c.bf16 %v25_v4, %v24_v2  ;;  %v20_v8 = vld [vmem:[%s419_s0] sm:$0xff]  ;;  %v316_v9 = vpack.c.bf16 %v27_v7, %v26_v6  ;;  %v28_v10 = vld [vmem:[%s420_s1 + $0x30] sm:$0xff]  ;;  %v29_v11 = vld [vmem:[%s420_s1 + $0x38] sm:$0xff] }
   0x4   :  { %309 = vmatprep.subr.bf16.mxu0 %v308_v3  ;;  %294 = vmatprep.mubr.msk.f32.mxu0 %vm37_vm0, %v20_v8  ;;  %v320_v12 = vpack.c.bf16 %v29_v11, %v28_v10  ;;  %v21_v13 = vld [vmem:[%s419_s0 + $0x8] sm:$0xff]  ;;  %v121_v14 = vld [vmem:[%s422_s3] sm:$0xff]  ;;  %v123_v16 = vld [vmem:[%s422_s3 + $0x10] sm:$0xff] }
   0x5   :  { %311 = vmatpush3.bf16.msra.mxu0 %v308_v3  ;;  %v122_v15 = vld [vmem:[%s422_s3 + $0x8] sm:$0xff]  ;;  %v124_v18 = vld [vmem:[%s422_s3 + $0x18] sm:$0xff]  ;;  %v256_v20 = vld [vmem:[%s421_s2] ss:$0 sm:$0xff] }
   0x6   :  { %313 = vmatprep.subr.bf16.mxu0 %v312_v5  ;;  %v324_v17 = vpack.c.bf16 %v122_v15, %v121_v14  ;;  %v328_v19 = vpack.c.bf16 %v124_v18, %v123_v16  ;;  %v259_v27 = vld [vmem:[%s423_s4] ss:$0 sm:$0xff] }
   0x8   :  { %325 = vmatprep.subr.bf16.mxu1 %v324_v17 }
   0x9   :  { %315 = vmatpush3.bf16.msra.mxu0 %v312_v5  ;;  %327 = vmatpush3.bf16.msra.mxu1 %v324_v17 }
   0xa   :  { %317 = vmatprep.subr.bf16.mxu0 %v316_v9  ;;  %329 = vmatprep.subr.bf16.mxu1 %v328_v19 }
   0xd   :  { %319 = vmatpush3.bf16.msra.mxu0 %v316_v9  ;;  %331 = vmatpush3.bf16.msra.mxu1 %v328_v19 }
   0xe   :  { %321 = vmatprep.subr.bf16.mxu0 %v320_v12 }
  0x11   :  { %323 = vmatpush3.bf16.msra.mxu0 %v320_v12 }
  0x14   :  { %295 = vmatmul.mubr.msk.f32.vlgmr.msra.gmra.mrb[0].mxu0 %vm37_vm0, %v21_v13 }
  0xe7   :  { %v296_v21 = vpop.f32.mrb[0].mxu0 }
  0xe8   :  { %v116_v22 = vadd.f32 %v296_v21, %v256_v20  ;;  %v110_v23 = vpop.f32.mrb[1].mxu0 }
  0xe9   :  { %v111_v24 = vadd.f32 %v256_v20, %v110_v23 }
  0xeb   :  { %332 = vtanh.f32 %v111_v24 }
  0xec   :  { %334 = vtanh.f32 %v116_v22 }
  0xf5   :  { %v333_v25 = vpop.eup %332 }
  0xf6   :  { %v335_v26 = vpop.eup %334  ;;  %305 = vmatprep.mubr.msk.f32.mxu1 %vm132_vm1, %v333_v25 }
  0xf7   :  { %306 = vmatmul.mubr.msk.f32.vlgmr.msra.gmra.mrb[0].mxu1 %vm132_vm1, %v335_v26 }
 0x1ca   :  { %v307_v28 = vpop.f32.mrb[0].mxu1 }
 0x1cb   :  { %v205_v29 = vpop.f32.mrb[1].mxu1 }
 0x1cc   :  { %v206_v30 = vadd.f32 %v259_v27, %v205_v29 }
 0x1ce   :  { %246 = vst [vmem:[%s424_s5] sm:$0xff] %v206_v30 }

</bundles_post_ra>
